<compile_context>
chip_gen: v5e
topology: v5e:2x2
jax: 0.10.0
libtpu: 0.0.40
codegen_flags: <defaults>
</compile_context>

<pallas_src>
import functools

import jax
import jax.numpy as jnp
from jax.experimental import pallas as pl
from jax.experimental.pallas import tpu as pltpu


def _regression_loss_kernel(x_ref, y_ref, o_ref):
    # (TM, D) tile; all reductions run along the lane axis (D).
    x = x_ref[...].astype(jnp.float32)
    y = y_ref[...].astype(jnp.float32)

    eps = jnp.float32(1e-12)  # F.normalize default eps

    # Three fused row reductions -- no normalized (TM, D) intermediates.
    # TODO(synk): for bf16 inputs on v7x (3.2 TB/s HBM) these VPU reductions
    # can become VALU-bound; if a bundle dump confirms it, contract over D on
    # the MXU (jnp.dot(x*x, ones((D,1)), preferred_element_type=f32)) instead.
    sxx = jnp.sum(x * x, axis=-1, keepdims=True)  # (TM, 1)
    syy = jnp.sum(y * y, axis=-1, keepdims=True)  # (TM, 1)
    sxy = jnp.sum(x * y, axis=-1, keepdims=True)  # (TM, 1)

    # Clamp each norm separately (F.normalize semantics), one EUP reciprocal.
    nx = jnp.maximum(jnp.sqrt(sxx), eps)
    ny = jnp.maximum(jnp.sqrt(syy), eps)
    inv = pl.reciprocal(nx * ny, approx=True)  # EUP slot, effectively free

    o_ref[...] = (2.0 - 2.0 * sxy * inv).astype(o_ref.dtype)


def _round_up(v, m):
    return ((v + m - 1) // m) * m


def _vmem_budgets():
    # Generation-aware budgets: half of physical VMEM for the 2-input x
    # 2-buffer input pipeline, 3/4 of physical as the compiler limit
    # (v7x: 32 / 48 MiB, v5e/v6e: 64 / 96 MiB).
    try:
        vmem = int(pltpu.get_tpu_info().vmem_capacity_bytes)
    except Exception:
        vmem = 64 << 20  # conservative fallback: v7x per-TC VMEM
    return vmem // 2, (vmem // 4) * 3


def _pick_tile_rows(n, d, itemsize, budget_bytes, target_block_bytes=6 << 20):
    # VMEM rows are lane-padded: D is held as a multiple of 128 elements.
    row_bytes = _round_up(d, 128) * itemsize
    # Aim for multi-MiB blocks to amortize the ~0.35 us per-step overhead ...
    tm = max(1, target_block_bytes // row_bytes)
    # ... but keep 2 inputs x 2 pipeline buffers inside the VMEM budget ...
    tm = min(tm, max(1, budget_bytes // (4 * row_bytes)))
    # ... and keep >= ~4 grid steps for large n so v7x can shard the
    # "parallel" axis across both TensorCores.
    tm = min(tm, max(_round_up(-(-n // 4), 128), 128))
    # Round to a layout-friendly row count (multiple of 128, or of 8 when
    # small) and never exceed n's sublane-padded extent.
    tm = (tm // 128) * 128 if tm >= 128 else max(8, (tm // 8) * 8)
    return min(tm, _round_up(n, 8))


@functools.partial(jax.jit, static_argnames=("tile_rows",))
def regression_loss(x, y, *, tile_rows=None):
    assert x.shape == y.shape and x.ndim == 2, "expected (N, D) inputs"
    n, d = x.shape
    budget_bytes, vmem_limit = _vmem_budgets()
    if tile_rows is not None:
        tm = min(_round_up(tile_rows, 8), _round_up(n, 8))
    else:
        tm = _pick_tile_rows(n, d, jnp.dtype(x.dtype).itemsize, budget_bytes)

    num_tiles = pl.cdiv(n, tm)

    # Ragged N: no wrapper-side jnp.pad (it would re-read/write all of x and y
    # in HBM). The last tile reads past the end (unspecified rows) and the
    # corresponding OOB output rows are dropped by the masked writeback.
    out = pl.pallas_call(
        _regression_loss_kernel,
        out_shape=jax.ShapeDtypeStruct((n, 1), jnp.float32),
        grid=(num_tiles,),
        in_specs=[
            pl.BlockSpec((tm, d), lambda i: (i, 0)),
            pl.BlockSpec((tm, d), lambda i: (i, 0)),
        ],
        out_specs=pl.BlockSpec((tm, 1), lambda i: (i, 0)),
        compiler_params=pltpu.CompilerParams(
            dimension_semantics=("parallel",),  # v7x: shard row tiles over 2 TCs
            vmem_limit_bytes=vmem_limit,
        ),
    )(x, y)
    # TODO(synk): if the producer can emit a D-major layout for D < 128, a
    # (D, tn) tiling would fill all 128 lanes; a wrapper-side transpose would
    # cost a full HBM pass on this mem-bound kernel, so it is not done here.
    return out.reshape(-1)


def _reference(x, y):
    eps = 1e-12
    xn = x / jnp.maximum(jnp.linalg.norm(x, axis=1, keepdims=True), eps)
    yn = y / jnp.maximum(jnp.linalg.norm(y, axis=1, keepdims=True), eps)
    return 2.0 - 2.0 * jnp.sum(xn * yn, axis=-1)


if __name__ == "__main__":
    key = jax.random.PRNGKey(0)
    kx, ky = jax.random.split(key)
    N, D = 24, 32
    x = jax.random.normal(kx, (N, D), dtype=jnp.float32)
    y = jax.random.normal(ky, (N, D), dtype=jnp.float32)

    ref = _reference(x, y)

    # Auto tile size: single (24, 32) tile (block equals the full array).
    loss = regression_loss(x, y)
    jax.block_until_ready(loss)
    assert loss.shape == (N,)
    assert jnp.allclose(loss, ref, atol=5e-3, rtol=5e-3)

    # Multi-tile ragged path: 2 tiles of 16 rows; the last tile reads past the
    # end and its out-of-bounds output rows are dropped.
    loss_t = regression_loss(x, y, tile_rows=16)
    jax.block_until_ready(loss_t)
    assert loss_t.shape == (N,)
    assert jnp.allclose(loss_t, ref, atol=5e-3, rtol=5e-3)

    print("KERNEL_OK")
</pallas_src>

<mosaic_0001>
module attributes {stable_mosaic.version = 11 : i64} {
  func.func @_regression_loss_kernel(%arg0: i32, %arg1: memref<24x32xf32, #tpu.memory_space<vmem>>, %arg2: memref<24x32xf32, #tpu.memory_space<vmem>>, %arg3: memref<24x1xf32, #tpu.memory_space<vmem>>) attributes {dimension_semantics = [#tpu.dimension_semantics<parallel>], iteration_bounds = array<i64: 1>, scalar_prefetch = 0 : i64, scratch_operands = 0 : i64, tpu.core_type = #tpu.core_type<tc>, window_params = [{transform_indices = @transform_0, window_bounds = array<i64: 24, 32>}, {transform_indices = @transform_1, window_bounds = array<i64: 24, 32>}, {transform_indices = @transform_2, window_bounds = array<i64: 24, 1>}]} {
    %c0 = arith.constant 0 : index
    %c0_0 = arith.constant 0 : index
    %0 = vector.load %arg1[%c0, %c0_0] : memref<24x32xf32, #tpu.memory_space<vmem>>, vector<24x32xf32>
    %c0_1 = arith.constant 0 : index
    %c0_2 = arith.constant 0 : index
    %1 = vector.load %arg2[%c0_1, %c0_2] : memref<24x32xf32, #tpu.memory_space<vmem>>, vector<24x32xf32>
    %2 = arith.mulf %0, %0 : vector<24x32xf32>
    %cst = arith.constant dense<0.000000e+00> : vector<24xf32>
    %3 = vector.multi_reduction <add>, %2, %cst [1] : vector<24x32xf32> to vector<24xf32>
    %4 = vector.shape_cast %3 : vector<24xf32> to vector<24x1xf32>
    %5 = arith.mulf %1, %1 : vector<24x32xf32>
    %cst_3 = arith.constant dense<0.000000e+00> : vector<24xf32>
    %6 = vector.multi_reduction <add>, %5, %cst_3 [1] : vector<24x32xf32> to vector<24xf32>
    %7 = vector.shape_cast %6 : vector<24xf32> to vector<24x1xf32>
    %8 = arith.mulf %0, %1 : vector<24x32xf32>
    %cst_4 = arith.constant dense<0.000000e+00> : vector<24xf32>
    %9 = vector.multi_reduction <add>, %8, %cst_4 [1] : vector<24x32xf32> to vector<24xf32>
    %10 = vector.shape_cast %9 : vector<24xf32> to vector<24x1xf32>
    %11 = math.sqrt %4 : vector<24x1xf32>
    %cst_5 = arith.constant 9.99999996E-13 : f32
    %12 = vector.broadcast %cst_5 : f32 to vector<24x1xf32>
    %13 = arith.maximumf %11, %12 : vector<24x1xf32>
    %14 = math.sqrt %7 : vector<24x1xf32>
    %cst_6 = arith.constant 9.99999996E-13 : f32
    %15 = vector.broadcast %cst_6 : f32 to vector<24x1xf32>
    %16 = arith.maximumf %14, %15 : vector<24x1xf32>
    %17 = arith.mulf %13, %16 : vector<24x1xf32>
    %18 = tpu.reciprocal %17 {approx = true} : vector<24x1xf32> -> vector<24x1xf32>
    %cst_7 = arith.constant 2.000000e+00 : f32
    %19 = vector.broadcast %cst_7 : f32 to vector<24x1xf32>
    %20 = arith.mulf %19, %10 : vector<24x1xf32>
    %21 = arith.mulf %20, %18 : vector<24x1xf32>
    %cst_8 = arith.constant 2.000000e+00 : f32
    %22 = vector.broadcast %cst_8 : f32 to vector<24x1xf32>
    %23 = arith.subf %22, %21 : vector<24x1xf32>
    %c0_9 = arith.constant 0 : index
    %c0_10 = arith.constant 0 : index
    %24 = vector.load %arg3[%c0_9, %c0_10] : memref<24x1xf32, #tpu.memory_space<vmem>>, vector<24x1xf32>
    tpu.vector_store %arg3[%c0_9, %c0_10], %23 {strides = array<i32>} : memref<24x1xf32, #tpu.memory_space<vmem>>, vector<24x1xf32>,
    return
  }
  func.func @transform_0(%arg0: i32) -> (i32, i32) {
    %c0_i32 = arith.constant 0 : i32
    %c0_i32_0 = arith.constant 0 : i32
    return %arg0, %c0_i32 : i32, i32
  }
  func.func @transform_1(%arg0: i32) -> (i32, i32) {
    %c0_i32 = arith.constant 0 : i32
    %c0_i32_0 = arith.constant 0 : i32
    return %arg0, %c0_i32 : i32, i32
  }
  func.func @transform_2(%arg0: i32) -> (i32, i32) {
    %c0_i32 = arith.constant 0 : i32
    %c0_i32_0 = arith.constant 0 : i32
    return %arg0, %c0_i32 : i32, i32
  }
}

</mosaic_0001>

<bundles_post_ra>
// kernel: regression_loss.1
= control target key start
LH: loop header
LB: loop body
LE: loop exit
PB: predicated region body
PF: predicated region fallthrough
CT: control target
= control target key end

     0   :  { %7 = vsyncpa [#allocation3], 0  ;;  %s378_s0 = inlined_call_operand.hbm [shape: f32[24,32], index: 0, kind: input, shape index: {}]   ;;  %s379_s1 = inlined_call_operand.hbm [shape: f32[24,32], index: 1, kind: input, shape index: {}]   ;;  %s380_s2 = inlined_call_operand.vmem [shape: f32[24,1], index: 2, kind: output, shape index: {}]  }
   0x1   :  { %s13_s11 = sshll.u32 %s378_s0, 4  ;;  %s14_s11 = int_to_ptr.hbm [resolvable:$true] %s13_s11 }
   0x2   :  { %8 = vsyncpa [#allocation5], 0  ;;  %s263_s12 = smov [#allocation2]   ;;  %s26_s16 = sshll.u32 %s379_s1, 4  ;;  %s27_s16 = int_to_ptr.hbm [resolvable:$true] %s26_s16 }
   0x3   :  { %s15_s13 = sshll.u32 %s263_s12, 4  ;;  %s264_s17 = smov 128   ;;  %s16_s13 = int_to_ptr.vmem [resolvable:$true] %s15_s13 }
   0x4   :  { %s265_s18 = smov 8   ;;  %s266_s19 = smov [#allocation4]  }
   0x5   :  { %21 = dma.hbm_to_vmem [thread:$0]  %s14_s11, 384, %s16_s13, [#allocation3], %s264_s17, %s264_s17, %s265_s18  }
   0x6   :  { %s28_s20 = sshll.u32 %s266_s19, 4  ;;  %s29_s20 = int_to_ptr.vmem [resolvable:$true] %s28_s20 }
   0x7   :  { %34 = dma.hbm_to_vmem [thread:$0]  %s27_s16, 384, %s29_s20, [#allocation5], %s264_s17, %s264_s17, %s265_s18  }
   0x8   :  { %259 = dma.done.wait [#allocation3], 384  }
   0x9   :  { %260 = vsyncadd [#allocation3], 4294966912 }
   0xa   :  { %261 = dma.done.wait [#allocation5], 384  }
   0xb   :  { %262 = vsyncadd [#allocation5], 4294966912  ;;  %v47_v0 = vld [vmem:[#allocation4 + $0x8] sm:$0xff]  ;;  %vm52_vm0 = vcmask 261120   ;;  %v45_v1 = vld [vmem:[#allocation2 + $0x10] sm:$0xff]  ;;  %vm179_vm13 = vcmask 7168  }
   0xc   :  { %v43_v2 = vld [vmem:[#allocation2] sm:$0xff]  ;;  %v63_v3 = vmul.f32 %v47_v0, %v47_v0  ;;  %v51_v4 = vmul.f32 %v45_v1, %v45_v1  ;;  %v48_v6 = vld [vmem:[#allocation4 + $0x10] sm:$0xff]  ;;  %v46_v7 = vld [vmem:[#allocation4] sm:$0xff] }
   0xd   :  { %v49_v5 = vmul.f32 %v43_v2, %v43_v2  ;;  %v44_v11 = vld [vmem:[#allocation2 + $0x8] sm:$0xff]  ;;  %v64_v12 = vmul.f32 %v48_v6, %v48_v6  ;;  %v62_v13 = vmul.f32 %v46_v7, %v46_v7  ;;  %v76_v18 = vmul.f32 %v48_v6, %v45_v1 }
   0xe   :  { %v68_v8 = vsel %vm52_vm0, %v63_v3, 0.0  ;;  %v59_v9 = vsel %vm52_vm0, %v51_v4, 0.0  ;;  %v50_v14 = vmul.f32 %v44_v11, %v44_v11  ;;  %v75_v19 = vmul.f32 %v47_v0, %v44_v11 }
   0xf   :  { %v53_v10 = vsel %vm52_vm0, %v49_v5, 0.0  ;;  %69 = vadd.xlane.f32.xlu2 %v68_v8  ;;  %60 = vadd.xlane.f32.xlu1 %v59_v9  ;;  %v71_v15 = vsel %vm52_vm0, %v64_v12, 0.0  ;;  %v65_v16 = vsel %vm52_vm0, %v62_v13, 0.0  ;;  %v74_v20 = vmul.f32 %v46_v7, %v43_v2 }
  0x10   :  { %54 = vadd.xlane.f32.xlu0 %v53_v10  ;;  %v56_v17 = vsel %vm52_vm0, %v50_v14, 0.0  ;;  %v83_v21 = vsel %vm52_vm0, %v76_v18, 0.0  ;;  %v80_v22 = vsel %vm52_vm0, %v75_v19, 0.0 }
  0x11   :  { %v77_v23 = vsel %vm52_vm0, %v74_v20, 0.0 }
  0x17   :  { %72 = vadd.xlane.f32.xlu2 %v71_v15  ;;  %66 = vadd.xlane.f32.xlu1 %v65_v16 }
  0x18   :  { %57 = vadd.xlane.f32.xlu0 %v56_v17 }
  0x1f   :  { %84 = vadd.xlane.f32.xlu2 %v83_v21  ;;  %81 = vadd.xlane.f32.xlu1 %v80_v22 }
  0x20   :  { %78 = vadd.xlane.f32.xlu0 %v77_v23 }
  0x82   :  { %v297_v24 = vpop.xlane.xlu2 %69  ;;  %v299_v25 = vpop.xlane.xlu1 %60 }
  0x83   :  { %193 = vrsqrt.f32 %v297_v24  ;;  %v302_v26 = vpop.xlane.xlu0 %54  ;;  %vm144_vm1 = vcmp.eq.f32.partialorder %v297_v24, inf  ;;  %v147_v55 = vand.u32 2147483648, %v297_v24  ;;  %vm117_vm2 = vcmp.eq.f32.partialorder %v299_v25, inf }
  0x84   :  { %195 = vrsqrt.f32 %v299_v25  ;;  %v120_v58 = vand.u32 2147483648, %v299_v25  ;;  %vm93_vm3 = vcmp.eq.f32.partialorder %v302_v26, inf  ;;  %v96_v62 = vand.u32 2147483648, %v302_v26 }
  0x85   :  { %197 = vrsqrt.f32 %v302_v26  ;;  %vm119_vm4 = vcmp.eq.f32.partialorder %v299_v25, 0.0  ;;  %vm146_vm6 = vcmp.eq.f32.partialorder %v297_v24, 0.0  ;;  %vm95_vm7 = vcmp.eq.f32.partialorder %v302_v26, 0.0 }
  0x89   :  { %v194_v27 = vpop.eup %193 }
  0x8a   :  { %v196_v28 = vpop.eup %195  ;;  %v138_v29 = vmul.f32 %v194_v27, %v297_v24  ;;  %v307_v30 = vpop.xlane.xlu2 %72 }
  0x8b   :  { %v309_v31 = vpop.xlane.xlu1 %66  ;;  %v198_v32 = vpop.eup %197  ;;  %v111_v33 = vmul.f32 %v196_v28, %v299_v25  ;;  %199 = vrsqrt.f32 %v307_v30  ;;  %vm156_vm5 = vcmp.eq.f32.partialorder %v307_v30, inf  ;;  %v159_v5 = vand.u32 2147483648, %v307_v30 }
  0x8c   :  { %v313_v34 = vpop.xlane.xlu0 %57  ;;  %v139_v35 = vmul.f32 %v194_v27, %v138_v29  ;;  %v87_v36 = vmul.f32 %v198_v32, %v302_v26  ;;  %201 = vrsqrt.f32 %v309_v31  ;;  %vm132_vm8 = vcmp.eq.f32.partialorder %v309_v31, inf }
  0x8d   :  { %v112_v37 = vmul.f32 %v196_v28, %v111_v33  ;;  %203 = vrsqrt.f32 %v313_v34  ;;  %v135_v9 = vand.u32 2147483648, %v309_v31  ;;  %vm105_vm9 = vcmp.eq.f32.partialorder %v313_v34, inf }
  0x8e   :  { %v140_v38 = vmul.f32 0.5, %v139_v35  ;;  %v88_v39 = vmul.f32 %v198_v32, %v87_v36  ;;  %v108_v15 = vand.u32 2147483648, %v313_v34  ;;  %vm158_vm10 = vcmp.eq.f32.partialorder %v307_v30, 0.0 }
  0x8f   :  { %v113_v40 = vmul.f32 0.5, %v112_v37  ;;  %vm107_vm11 = vcmp.eq.f32.partialorder %v313_v34, 0.0  ;;  %vm134_vm12 = vcmp.eq.f32.partialorder %v309_v31, 0.0 }
  0x90   :  { %v141_v41 = vsub.f32 1.5, %v140_v38  ;;  %v89_v42 = vmul.f32 0.5, %v88_v39 }
  0x91   :  { %v200_v43 = vpop.eup %199  ;;  %v114_v44 = vsub.f32 1.5, %v113_v40 }
  0x92   :  { %v202_v45 = vpop.eup %201  ;;  %v90_v46 = vsub.f32 1.5, %v89_v42  ;;  %v150_v47 = vmul.f32 %v200_v43, %v307_v30  ;;  %v142_v51 = vmul.f32 %v194_v27, %v141_v41  ;;  %v85_v36 = vpop.xlane.xlu2 %84 }
  0x93   :  { %v204_v48 = vpop.eup %203  ;;  %v115_v49 = vmul.f32 %v196_v28, %v114_v44  ;;  %v126_v50 = vmul.f32 %v202_v45, %v309_v31  ;;  %v172_v39 = vmul.f32 2.0, %v85_v36 }
  0x94   :  { %v91_v52 = vmul.f32 %v198_v32, %v90_v46  ;;  %v151_v53 = vmul.f32 %v200_v43, %v150_v47  ;;  %v99_v54 = vmul.f32 %v204_v48, %v313_v34  ;;  %v143_v0 = vmul.f32 %v142_v51, %v297_v24  ;;  %v79_v38 = vpop.xlane.xlu0 %78 }
  0x95   :  { %v127_v56 = vmul.f32 %v202_v45, %v126_v50  ;;  %v116_v57 = vmul.f32 %v115_v49, %v299_v25  ;;  %v170_v40 = vmul.f32 2.0, %v79_v38 }
  0x96   :  { %v152_v59 = vmul.f32 0.5, %v151_v53  ;;  %v100_v60 = vmul.f32 %v204_v48, %v99_v54  ;;  %v92_v61 = vmul.f32 %v91_v52, %v302_v26  ;;  %v145_v13 = vsel %vm144_vm1, %v297_v24, %v143_v0 }
  0x97   :  { %v128_v63 = vmul.f32 0.5, %v127_v56  ;;  %v118_v7 = vsel %vm117_vm2, %v299_v25, %v116_v57  ;;  %v148_v21 = vsel %vm146_vm6, %v147_v55, %v145_v13 }
  0x98   :  { %v153_v1 = vsub.f32 1.5, %v152_v59  ;;  %v101_v2 = vmul.f32 0.5, %v100_v60  ;;  %v94_v10 = vsel %vm93_vm3, %v302_v26, %v92_v61  ;;  %v121_v16 = vsel %vm119_vm4, %v120_v58, %v118_v7 }
  0x99   :  { %v129_v3 = vsub.f32 1.5, %v128_v63  ;;  %v97_v19 = vsel %vm95_vm7, %v96_v62, %v94_v10  ;;  %v124_v25 = vmax.f32 %v121_v16, 1e-12  ;;  %v162_v33 = vmax.f32 %v148_v21, 1e-12 }
  0x9a   :  { %v154_v4 = vmul.f32 %v200_v43, %v153_v1  ;;  %v102_v6 = vsub.f32 1.5, %v101_v2  ;;  %v122_v26 = vmax.f32 %v97_v19, 1e-12 }
  0x9b   :  { %v130_v8 = vmul.f32 %v202_v45, %v129_v3 }
  0x9c   :  { %v155_v11 = vmul.f32 %v154_v4, %v307_v30  ;;  %v103_v12 = vmul.f32 %v204_v48, %v102_v6 }
  0x9d   :  { %v131_v14 = vmul.f32 %v130_v8, %v309_v31 }
  0x9e   :  { %v104_v17 = vmul.f32 %v103_v12, %v313_v34  ;;  %v157_v18 = vsel %vm156_vm5, %v307_v30, %v155_v11 }
  0x9f   :  { %v160_v20 = vsel %vm158_vm10, %v159_v5, %v157_v18  ;;  %v133_v22 = vsel %vm132_vm8, %v309_v31, %v131_v14  ;;  %v82_v31 = vpop.xlane.xlu1 %81 }
  0xa0   :  { %v163_v23 = vmax.f32 %v160_v20, 1e-12  ;;  %v106_v27 = vsel %vm105_vm9, %v313_v34, %v104_v17  ;;  %v136_v28 = vsel %vm134_vm12, %v135_v9, %v133_v22  ;;  %v171_v41 = vmul.f32 2.0, %v82_v31 }
  0xa1   :  { %v109_v29 = vsel %vm107_vm11, %v108_v15, %v106_v27  ;;  %v161_v30 = vmax.f32 %v136_v28, 1e-12 }
  0xa2   :  { %v166_v32 = vmul.f32 %v163_v23, %v124_v25  ;;  %v123_v24 = vmax.f32 %v109_v29, 1e-12 }
  0xa3   :  { %v164_v35 = vmul.f32 %v161_v30, %v122_v26 }
  0xa4   :  { %205 = vrcp.f32 %v166_v32  ;;  %v165_v37 = vmul.f32 %v162_v33, %v123_v24 }
  0xa5   :  { %207 = vrcp.f32 %v164_v35 }
  0xa6   :  { %209 = vrcp.f32 %v165_v37 }
  0xaa   :  { %v206_v42 = vpop.eup %205 }
  0xab   :  { %v208_v34 = vpop.eup %207  ;;  %v175_v43 = vmul.f32 %v206_v42, %v172_v39 }
  0xac   :  { %v210_v44 = vpop.eup %209  ;;  %v173_v45 = vmul.f32 %v208_v34, %v170_v40 }
  0xad   :  { %v178_v46 = vsub.f32 2.0, %v175_v43  ;;  %v174_v47 = vmul.f32 %v210_v44, %v171_v41 }
  0xae   :  { %v176_v48 = vsub.f32 2.0, %v173_v45 }
  0xaf   :  { %182 = vst.msk [vmem:[%s380_s2 + $0x10] sm:$0xff] %vm179_vm13, %v178_v46  ;;  %v177_v49 = vsub.f32 2.0, %v174_v47 }
  0xb0   :  { %180 = vst.msk [vmem:[%s380_s2] sm:$0xff] %vm179_vm13, %v176_v48 }
  0xb1   :  { %181 = vst.msk [vmem:[%s380_s2 + $0x8] sm:$0xff] %vm179_vm13, %v177_v49 }
  0xb2   :  { %187 = vsyncpa [#allocation3], 1 }
  0xb3   :  { %188 = vsyncpa [#allocation5], 1 }

</bundles_post_ra>
